<compile_context>
chip_gen: v7x
topology: tpu7x:2x2x1
jax: 0.10.0
libtpu: 0.0.40
codegen_flags: <defaults>
</compile_context>

<pallas_src>
import math

import jax
import jax.numpy as jnp
from jax import lax
from jax.experimental import pallas as pl
from jax.experimental.pallas import tpu as pltpu


LANE = 128
SUBLANE = 8
MAX_BATCH_TILE = 256  # full MXU height on v6e/v7x


def _round_up(x, m):
    return (x + m - 1) // m * m


# ---------------------------------------------------------------------------
# Fused kernel body: x, (W^T, b, g) x num_hidden, W_out^T, b_out -> out
# ---------------------------------------------------------------------------
def _make_fused_kernel(num_hidden):
    def kernel(*refs):
        x_ref = refs[0]
        o_ref = refs[-1]
        h = x_ref[...]  # (BT, K0) f32
        idx = 1
        for _ in range(num_hidden):
            w_ref, b_ref, g_ref = refs[idx], refs[idx + 1], refs[idx + 2]
            idx += 3
            # bf16 operands into the MXU, f32 accumulation; weight is the
            # lane-dense (out, in) layout, so contract K = axis 1 of both.
            y = lax.dot_general(
                h.astype(jnp.bfloat16), w_ref[...],
                dimension_numbers=(((1,), (1,)), ((), ())),
                preferred_element_type=jnp.float32)
            # f32 bias + gate tail on the VPU (v5e-safe).
            h = (y + b_ref[...]) * g_ref[...].astype(jnp.float32)
        wo_ref, bo_ref = refs[idx], refs[idx + 1]
        y = lax.dot_general(
            h.astype(jnp.bfloat16), wo_ref[...],
            dimension_numbers=(((1,), (1,)), ((), ())),
            preferred_element_type=jnp.float32)
        o_ref[...] = (y + bo_ref[...]).astype(o_ref.dtype)

    return kernel


# ---------------------------------------------------------------------------
# Wrapper: one pallas_call, batch-tiled grid, weights VMEM-resident.
# ---------------------------------------------------------------------------
def fused_fc_value_forward(x_flat, gating_signals, layer_params, out_params,
                           num_classes):
    """x_flat (B, in) f32; layer_params: [(W^T bf16 (out,in), b f32 (1,out))];
    out_params: (W_out^T bf16 (nc_pad,in), b_out f32 (1,nc_pad))."""
    B, in_size = x_flat.shape
    wo_t, bo = out_params
    nc_pad = wo_t.shape[0]
    num_hidden = len(layer_params)

    # Batch padding / tiling.
    b_pad8 = _round_up(max(B, 1), SUBLANE)
    bt = min(b_pad8, MAX_BATCH_TILE)
    b_pad = _round_up(b_pad8, bt)
    n_tiles = b_pad // bt

    x_p = jnp.pad(x_flat, ((0, b_pad - B), (0, 0)))
    gates_p = [jnp.pad(g, ((0, b_pad - B), (0, 0))).astype(jnp.bfloat16)
               for g in gating_signals]

    operands = [x_p]
    in_specs = [pl.BlockSpec((bt, in_size), lambda i: (i, 0))]
    for (w_t, b), g in zip(layer_params, gates_p):
        n = w_t.shape[0]
        operands += [w_t, b, g]
        in_specs += [
            pl.BlockSpec(w_t.shape, lambda i: (0, 0)),  # weight: VMEM-resident
            pl.BlockSpec(b.shape, lambda i: (0, 0)),    # bias:   VMEM-resident
            pl.BlockSpec((bt, n), lambda i: (i, 0)),    # gate:   streams with batch
        ]
    operands += [wo_t, bo]
    in_specs += [pl.BlockSpec(wo_t.shape, lambda i: (0, 0)),
                 pl.BlockSpec(bo.shape, lambda i: (0, 0))]

    out_specs = pl.BlockSpec((bt, nc_pad), lambda i: (i, 0))
    out_shape = jax.ShapeDtypeStruct((b_pad, nc_pad), x_flat.dtype)

    # Advisory cost estimate.
    flops = 0
    prev = in_size
    for w_t, _ in layer_params:
        flops += 2 * b_pad * prev * w_t.shape[0]
        prev = w_t.shape[0]
    flops += 2 * b_pad * prev * nc_pad
    bytes_accessed = sum(int(a.size) * a.dtype.itemsize for a in operands)
    bytes_accessed += int(b_pad) * int(nc_pad) * jnp.dtype(x_flat.dtype).itemsize
    cost = pl.CostEstimate(flops=flops, transcendentals=0,
                           bytes_accessed=bytes_accessed)

    out = pl.pallas_call(
        _make_fused_kernel(num_hidden),
        out_shape=out_shape,
        grid_spec=pltpu.PrefetchScalarGridSpec(
            num_scalar_prefetch=0,
            grid=(n_tiles,),
            in_specs=in_specs,
            out_specs=out_specs,
        ),
        compiler_params=pltpu.CompilerParams(
            dimension_semantics=("parallel",)),  # shards batch tiles over v7x's 2 TCs
        cost_estimate=cost,
    )(*operands)
    return out[:B, :num_classes]


# ---------------------------------------------------------------------------
# Parameter init (PyTorch nn.Linear conventions) + kernel packing.
# ---------------------------------------------------------------------------
def init_params(key, nodes_in_each_layer_list, input_size, num_classes):
    """Deterministic init, nn.Linear layout: weight (out, in), bias (out,)."""
    layers = []
    prev = input_size
    for n in list(nodes_in_each_layer_list) + [num_classes]:
        key, kw, kb = jax.random.split(key, 3)
        bound = 1.0 / math.sqrt(prev)
        w = jax.random.uniform(kw, (n, prev), jnp.float32, -bound, bound)
        b = jax.random.uniform(kb, (n,), jnp.float32, -bound, bound)
        layers.append((w, b))
        prev = n
    return layers[:-1], layers[-1]


def pack_params_for_kernel(params, out_params, num_classes):
    """bf16, lane-dense (out, in) weights; f32 (1, out) biases; padded head."""
    packed = [(w.astype(jnp.bfloat16), b.reshape(1, -1).astype(jnp.float32))
              for w, b in params]
    wo, bo = out_params
    nc_pad = _round_up(num_classes, LANE)
    wo_t = jnp.zeros((nc_pad, wo.shape[1]), jnp.bfloat16)
    wo_t = wo_t.at[:num_classes].set(wo.astype(jnp.bfloat16))
    bo_p = jnp.zeros((1, nc_pad), jnp.float32).at[0, :num_classes].set(bo)
    return packed, (wo_t, bo_p)


# ---------------------------------------------------------------------------
# Module-level forward (mirrors ALLONES_FC_Value_Network.forward, verbose<=2,
# gating signals of shape (B, hidden) so the unsqueeze branches never fire).
# ---------------------------------------------------------------------------
def allones_fc_value_network_forward(inp, gating_signals, packed_params,
                                     packed_out, num_classes):
    x_flat = inp.reshape(inp.shape[0], -1)  # torch.flatten(inp, 1)
    # TODO(synk): rank-mismatch unsqueeze branches of the PyTorch forward are
    # pure shape glue and are not exercised with (B, hidden) gating signals.
    return fused_fc_value_forward(x_flat, gating_signals, packed_params,
                                  packed_out, num_classes)


# ---------------------------------------------------------------------------
# Reference (plain JAX) mirroring the kernel's bf16 quantization, for checking
# the Pallas plumbing rather than the (intentional) bf16 rounding.
# ---------------------------------------------------------------------------
def reference_forward(inp, gating_signals, packed_params, packed_out,
                      num_classes):
    h = inp.reshape(inp.shape[0], -1).astype(jnp.float32)
    for (w_t, b), g in zip(packed_params, gating_signals):
        y = lax.dot_general(h.astype(jnp.bfloat16), w_t,
                            dimension_numbers=(((1,), (1,)), ((), ())),
                            preferred_element_type=jnp.float32)
        h = (y + b) * g.astype(jnp.bfloat16).astype(jnp.float32)
    wo_t, bo = packed_out
    y = lax.dot_general(h.astype(jnp.bfloat16), wo_t,
                        dimension_numbers=(((1,), (1,)), ((), ())),
                        preferred_element_type=jnp.float32)
    return (y + bo)[:, :num_classes]


if __name__ == "__main__":
    key = jax.random.PRNGKey(0)

    # Small shapes consistent with the module: NCHW input, two hidden FC layers.
    B, C, H, W = 2, 4, 16, 16
    input_size = C * H * W              # 1024
    nodes_in_each_layer_list = [32, 32]
    num_classes = 10

    key, k_inp, k_g0, k_g1, k_params = jax.random.split(key, 5)
    x = jax.random.normal(k_inp, (B, C, H, W), jnp.float32)
    gating_signals = [
        jax.random.uniform(k_g0, (B, nodes_in_each_layer_list[0]), jnp.float32),
        jax.random.uniform(k_g1, (B, nodes_in_each_layer_list[1]), jnp.float32),
    ]

    params, out_params = init_params(
        k_params, nodes_in_each_layer_list, input_size, num_classes)
    packed_params, packed_out = pack_params_for_kernel(
        params, out_params, num_classes)

    out = allones_fc_value_network_forward(
        x, gating_signals, packed_params, packed_out, num_classes)
    out = jax.block_until_ready(out)

    ref = reference_forward(
        x, gating_signals, packed_params, packed_out, num_classes)

    assert out.shape == (B, num_classes)
    assert jnp.allclose(out, ref, atol=2e-3, rtol=2e-3), "mismatch vs reference"

    print("KERNEL_OK")
</pallas_src>

<mosaic_0001>
module attributes {stable_mosaic.version = 11 : i64} {
  func.func @kernel(%arg0: i32, %arg1: memref<8x1024xf32, #tpu.memory_space<vmem>>, %arg2: memref<32x1024xbf16, #tpu.memory_space<vmem>>, %arg3: memref<1x32xf32, #tpu.memory_space<vmem>>, %arg4: memref<8x32xbf16, #tpu.memory_space<vmem>>, %arg5: memref<32x32xbf16, #tpu.memory_space<vmem>>, %arg6: memref<1x32xf32, #tpu.memory_space<vmem>>, %arg7: memref<8x32xbf16, #tpu.memory_space<vmem>>, %arg8: memref<128x32xbf16, #tpu.memory_space<vmem>>, %arg9: memref<1x128xf32, #tpu.memory_space<vmem>>, %arg10: memref<8x128xf32, #tpu.memory_space<vmem>>) attributes {dimension_semantics = [#tpu.dimension_semantics<parallel>], iteration_bounds = array<i64: 1>, scalar_prefetch = 0 : i64, scratch_operands = 0 : i64, tpu.core_type = #tpu.core_type<tc>, window_params = [{transform_indices = @transform_0, window_bounds = array<i64: 8, 1024>}, {pipeline_mode = #tpu.pipeline_mode<synchronous>, transform_indices = @transform_1, window_bounds = array<i64: 32, 1024>}, {pipeline_mode = #tpu.pipeline_mode<synchronous>, transform_indices = @transform_2, window_bounds = array<i64: 1, 32>}, {transform_indices = @transform_3, window_bounds = array<i64: 8, 32>}, {pipeline_mode = #tpu.pipeline_mode<synchronous>, transform_indices = @transform_4, window_bounds = array<i64: 32, 32>}, {pipeline_mode = #tpu.pipeline_mode<synchronous>, transform_indices = @transform_5, window_bounds = array<i64: 1, 32>}, {transform_indices = @transform_6, window_bounds = array<i64: 8, 32>}, {pipeline_mode = #tpu.pipeline_mode<synchronous>, transform_indices = @transform_7, window_bounds = array<i64: 128, 32>}, {pipeline_mode = #tpu.pipeline_mode<synchronous>, transform_indices = @transform_8, window_bounds = array<i64: 1, 128>}, {transform_indices = @transform_9, window_bounds = array<i64: 8, 128>}]} {
    %c0 = arith.constant 0 : index
    %c0_0 = arith.constant 0 : index
    %0 = vector.load %arg1[%c0, %c0_0] : memref<8x1024xf32, #tpu.memory_space<vmem>>, vector<8x1024xf32>
    %1 = arith.truncf %0 : vector<8x1024xf32> to vector<8x1024xbf16>
    %c0_1 = arith.constant 0 : index
    %c0_2 = arith.constant 0 : index
    %2 = vector.load %arg2[%c0_1, %c0_2] : memref<32x1024xbf16, #tpu.memory_space<vmem>>, vector<32x1024xbf16>
    %cst = arith.constant dense<0.000000e+00> : vector<8x32xf32>
    %3 = tpu.matmul %1, %2, %cst {dimension_numbers = #tpu.dot_dimension_numbers<[1], [1], [0], [0], [0, 0, 1, 0], [], []>} : vector<8x1024xbf16>, vector<32x1024xbf16>, vector<8x32xf32> -> vector<8x32xf32>
    %c0_3 = arith.constant 0 : index
    %c0_4 = arith.constant 0 : index
    %4 = vector.load %arg3[%c0_3, %c0_4] : memref<1x32xf32, #tpu.memory_space<vmem>>, vector<1x32xf32>
    %5 = vector.broadcast %4 : vector<1x32xf32> to vector<8x32xf32>
    %6 = arith.addf %3, %5 : vector<8x32xf32>
    %c0_5 = arith.constant 0 : index
    %c0_6 = arith.constant 0 : index
    %7 = vector.load %arg4[%c0_5, %c0_6] : memref<8x32xbf16, #tpu.memory_space<vmem>>, vector<8x32xbf16>
    %8 = arith.extf %7 : vector<8x32xbf16> to vector<8x32xf32>
    %9 = arith.mulf %6, %8 : vector<8x32xf32>
    %10 = arith.truncf %9 : vector<8x32xf32> to vector<8x32xbf16>
    %c0_7 = arith.constant 0 : index
    %c0_8 = arith.constant 0 : index
    %11 = vector.load %arg5[%c0_7, %c0_8] : memref<32x32xbf16, #tpu.memory_space<vmem>>, vector<32x32xbf16>
    %cst_9 = arith.constant dense<0.000000e+00> : vector<8x32xf32>
    %12 = tpu.matmul %10, %11, %cst_9 {dimension_numbers = #tpu.dot_dimension_numbers<[1], [1], [0], [0], [0, 0, 1, 0], [], []>} : vector<8x32xbf16>, vector<32x32xbf16>, vector<8x32xf32> -> vector<8x32xf32>
    %c0_10 = arith.constant 0 : index
    %c0_11 = arith.constant 0 : index
    %13 = vector.load %arg6[%c0_10, %c0_11] : memref<1x32xf32, #tpu.memory_space<vmem>>, vector<1x32xf32>
    %14 = vector.broadcast %13 : vector<1x32xf32> to vector<8x32xf32>
    %15 = arith.addf %12, %14 : vector<8x32xf32>
    %c0_12 = arith.constant 0 : index
    %c0_13 = arith.constant 0 : index
    %16 = vector.load %arg7[%c0_12, %c0_13] : memref<8x32xbf16, #tpu.memory_space<vmem>>, vector<8x32xbf16>
    %17 = arith.extf %16 : vector<8x32xbf16> to vector<8x32xf32>
    %18 = arith.mulf %15, %17 : vector<8x32xf32>
    %19 = arith.truncf %18 : vector<8x32xf32> to vector<8x32xbf16>
    %c0_14 = arith.constant 0 : index
    %c0_15 = arith.constant 0 : index
    %20 = vector.load %arg8[%c0_14, %c0_15] : memref<128x32xbf16, #tpu.memory_space<vmem>>, vector<128x32xbf16>
    %cst_16 = arith.constant dense<0.000000e+00> : vector<8x128xf32>
    %21 = tpu.matmul %19, %20, %cst_16 {dimension_numbers = #tpu.dot_dimension_numbers<[1], [1], [0], [0], [0, 0, 1, 0], [], []>} : vector<8x32xbf16>, vector<128x32xbf16>, vector<8x128xf32> -> vector<8x128xf32>
    %c0_17 = arith.constant 0 : index
    %c0_18 = arith.constant 0 : index
    %22 = vector.load %arg9[%c0_17, %c0_18] : memref<1x128xf32, #tpu.memory_space<vmem>>, vector<1x128xf32>
    %23 = vector.broadcast %22 : vector<1x128xf32> to vector<8x128xf32>
    %24 = arith.addf %21, %23 : vector<8x128xf32>
    %c0_19 = arith.constant 0 : index
    %c0_20 = arith.constant 0 : index
    %25 = vector.load %arg10[%c0_19, %c0_20] : memref<8x128xf32, #tpu.memory_space<vmem>>, vector<8x128xf32>
    tpu.vector_store %arg10[%c0_19, %c0_20], %24 {strides = array<i32>} : memref<8x128xf32, #tpu.memory_space<vmem>>, vector<8x128xf32>,
    return
  }
  func.func @transform_0(%arg0: i32) -> (i32, i32) {
    %c0_i32 = arith.constant 0 : i32
    %c0_i32_0 = arith.constant 0 : i32
    return %arg0, %c0_i32 : i32, i32
  }
  func.func @transform_1(%arg0: i32) -> (i32, i32) {
    %c0_i32 = arith.constant 0 : i32
    %c0_i32_0 = arith.constant 0 : i32
    %c0_i32_1 = arith.constant 0 : i32
    return %c0_i32, %c0_i32_0 : i32, i32
  }
  func.func @transform_2(%arg0: i32) -> (i32, i32) {
    %c0_i32 = arith.constant 0 : i32
    %c0_i32_0 = arith.constant 0 : i32
    %c0_i32_1 = arith.constant 0 : i32
    return %c0_i32, %c0_i32_0 : i32, i32
  }
  func.func @transform_3(%arg0: i32) -> (i32, i32) {
    %c0_i32 = arith.constant 0 : i32
    %c0_i32_0 = arith.constant 0 : i32
    return %arg0, %c0_i32 : i32, i32
  }
  func.func @transform_4(%arg0: i32) -> (i32, i32) {
    %c0_i32 = arith.constant 0 : i32
    %c0_i32_0 = arith.constant 0 : i32
    %c0_i32_1 = arith.constant 0 : i32
    return %c0_i32, %c0_i32_0 : i32, i32
  }
  func.func @transform_5(%arg0: i32) -> (i32, i32) {
    %c0_i32 = arith.constant 0 : i32
    %c0_i32_0 = arith.constant 0 : i32
    %c0_i32_1 = arith.constant 0 : i32
    return %c0_i32, %c0_i32_0 : i32, i32
  }
  func.func @transform_6(%arg0: i32) -> (i32, i32) {
    %c0_i32 = arith.constant 0 : i32
    %c0_i32_0 = arith.constant 0 : i32
    return %arg0, %c0_i32 : i32, i32
  }
  func.func @transform_7(%arg0: i32) -> (i32, i32) {
    %c0_i32 = arith.constant 0 : i32
    %c0_i32_0 = arith.constant 0 : i32
    %c0_i32_1 = arith.constant 0 : i32
    return %c0_i32, %c0_i32_0 : i32, i32
  }
  func.func @transform_8(%arg0: i32) -> (i32, i32) {
    %c0_i32 = arith.constant 0 : i32
    %c0_i32_0 = arith.constant 0 : i32
    %c0_i32_1 = arith.constant 0 : i32
    return %c0_i32, %c0_i32_0 : i32, i32
  }
  func.func @transform_9(%arg0: i32) -> (i32, i32) {
    %c0_i32 = arith.constant 0 : i32
    %c0_i32_0 = arith.constant 0 : i32
    return %arg0, %c0_i32 : i32, i32
  }
}

</mosaic_0001>

<bundles_post_ra>
// kernel: tpu_custom_call.1
= control target key start
LH: loop header
LB: loop body
LE: loop exit
PB: predicated region body
PF: predicated region fallthrough
CT: control target
= control target key end

     0   :  { %14 = vsyncpa [#allocation3], 0  ;;  %s875_s0 = inlined_call_operand.vmem [shape: f32[8,1024], index: 0, kind: input, shape index: {}]   ;;  %s876_s1 = inlined_call_operand.hbm [shape: bf16[32,1024], index: 1, kind: input, shape index: {}]   ;;  %s877_s2 = inlined_call_operand.vmem [shape: f32[1,32], index: 2, kind: input, shape index: {}]   ;;  %s878_s3 = inlined_call_operand.vmem [shape: bf16[8,32], index: 3, kind: input, shape index: {}]   ;;  %s879_s4 = inlined_call_operand.vmem [shape: bf16[32,32], index: 4, kind: input, shape index: {}]   ;;  %s880_s5 = inlined_call_operand.vmem [shape: f32[1,32], index: 5, kind: input, shape index: {}]   ;;  %s881_s6 = inlined_call_operand.vmem [shape: bf16[8,32], index: 6, kind: input, shape index: {}]   ;;  %s882_s7 = inlined_call_operand.vmem [shape: bf16[128,32], index: 7, kind: input, shape index: {}]   ;;  %s883_s8 = inlined_call_operand.vmem [shape: f32[1,128], index: 8, kind: input, shape index: {}]   ;;  %s884_s9 = inlined_call_operand.hbm [shape: f32[8,128], index: 9, kind: output, shape index: {}]  }
   0x1   :  { %15 = vsyncpa [#allocation4], 0  ;;  %s700_s30 = smov [#allocation2]   ;;  %s652_s13 = scalar_lea.hbm %s876_s1, 2048 }
   0x2   :  { %s23_s10 = sshll.u32 %s700_s30, 4  ;;  %p653_p0 = scmp.ne.s32.totalorder %s876_s1, %s652_s13  ;;  %s24_s10 = int_to_ptr.vmem [resolvable:$true] %s23_s10 }
   0x3   :  { %p656_p1 = scmp.lt.u32.totalorder %s652_s13, %s876_s1 }
   0x5   :  { %p658_p2 = pnand %p656_p1, %p653_p0 }
   0x7   :  { %661 = shalt.err (!%p658_p2)
}
   0x8   :  { %s662_s18 = scalar_lea.vmem %s24_s10, 2048  ;;  %p667_p4 = scmp.lt.s32.totalorder %s24_s10, %s24_s10 }
   0x9   :  { %p663_p3 = scmp.ne.s32.totalorder %s24_s10, %s662_s18  ;;  %p668_p5 = scmp.lt.s32.totalorder %s662_s18, %s662_s18 }
   0xb   :  { %p669_p6 = por %p668_p5, %p667_p4 }
   0xd   :  { %p670_p7 = pnand %p669_p6, %p663_p3 }
   0xf   :  { %673 = shalt.err (!%p670_p7)
}
  0x10   :  { %s701_s19 = smov 512   ;;  %s702_s20 = smov 32  }
  0x11   :  { %29 = dma.hbm_to_vmem [thread:$0]  %s876_s1, 2048, %s24_s10, [#allocation3], %s701_s19, %s701_s19, %s702_s20  }
  0x12   :  { %696 = dma.done.wait [#allocation3], 2048  }
  0x13   :  { %697 = vsyncadd [#allocation3], 4294965248  ;;  %v703_v0 = vmov 0.0   ;;  %v64_v1 = vld [vmem:[#allocation2] sm:$0xff]  ;;  %v49_v7 = vld [vmem:[%s875_s0 + $0x8] sm:$0xff]  ;;  %vm352_vm0 = vcmask 261120  }
  0x14   :  { %595 = vmatprep.subr.bf16.mxu1 %v703_v0  ;;  %v68_v2 = vld [vmem:[#allocation2 + $0x20] sm:$0xff]  ;;  %v57_v9 = vpack.c.bf16 %v49_v7, %v49_v7  ;;  %v65_v10 = vld [vmem:[#allocation2 + $0x8] sm:$0xff]  ;;  %v51_v17 = vld [vmem:[%s875_s0 + $0x18] sm:$0xff]  ;;  %vm704_vm1 = vmmov 0   ;;  %s705_s20 = smov [#allocation5]  }
  0x15   :  { %v72_v3 = vld [vmem:[#allocation2 + $0x40] sm:$0xff]  ;;  %v554_v4 = vcombine.high %v64_v1, %v68_v2  ;;  %v553_v5 = vcombine.low %v64_v1, %v68_v2  ;;  %v69_v11 = vld [vmem:[#allocation2 + $0x28] sm:$0xff]  ;;  %v59_v22 = vpack.c.bf16 %v51_v17, %v51_v17  ;;  %v66_v24 = vld [vmem:[#allocation2 + $0x10] sm:$0xff]  ;;  %599 = vmatprep.mubr.msk.bf16.mxu1 %vm704_vm1, %v703_v0 }
  0x16   :  { %v76_v6 = vld [vmem:[#allocation2 + $0x60] sm:$0xff]  ;;  %199 = vmatprep.mubr.bf16.mxu0 %v57_v9  ;;  %v556_v14 = vcombine.high %v65_v10, %v69_v11  ;;  %v73_v18 = vld [vmem:[#allocation2 + $0x48] sm:$0xff]  ;;  %v555_v21 = vcombine.low %v65_v10, %v69_v11  ;;  %v70_v25 = vld [vmem:[#allocation2 + $0x30] sm:$0xff] }
  0x17   :  { %v562_v8 = vcombine.high %v72_v3, %v76_v6  ;;  %167 = vmatprep.subr.bf16.mxu0 %v554_v4  ;;  %v561_v12 = vcombine.low %v72_v3, %v76_v6  ;;  %v642_v13 = vld [vmem:[%s879_s4] sm:$0xff]   ;;  %v77_v19 = vld [vmem:[#allocation2 + $0x68] sm:$0xff]  ;;  %v558_v27 = vcombine.high %v66_v24, %v70_v25  ;;  %v50_v28 = vld [vmem:[%s875_s0 + $0x10] sm:$0xff]  ;;  %v557_v33 = vcombine.low %v66_v24, %v70_v25 }
  0x18   :  { %168 = vmatpush1.bf16.xpose.msra.mxu0 %v553_v5  ;;  %v48_v15 = vld [vmem:[%s875_s0] sm:$0xff]  ;;  %v357_v16 = vsel %vm352_vm0, %v642_v13, 0  ;;  %v564_v23 = vcombine.high %v73_v18, %v77_v19  ;;  %v563_v26 = vcombine.low %v73_v18, %v77_v19  ;;  %v53_v29 = vld [vmem:[%s875_s0 + $0x28] sm:$0xff]  ;;  %v74_v30 = vld [vmem:[#allocation2 + $0x50] sm:$0xff]  ;;  %v58_v32 = vpack.c.bf16 %v50_v28, %v50_v28 }
  0x19   :  { %169 = vmatprep.subr.bf16.mxu0 %v562_v8  ;;  %596 = vmatpush3.bf16.xpose.msra.mxu1 %v357_v16  ;;  %v56_v20 = vpack.c.bf16 %v48_v15, %v48_v15  ;;  %v78_v31 = vld [vmem:[#allocation2 + $0x70] sm:$0xff]  ;;  %v61_v34 = vpack.c.bf16 %v53_v29, %v53_v29  ;;  %v67_v36 = vld [vmem:[#allocation2 + $0x18] sm:$0xff]  ;;  %v52_v40 = vld [vmem:[%s875_s0 + $0x20] sm:$0xff] }
  0x1a   :  { %597 = vmatprep.subr.bf16.mxu1 %v703_v0  ;;  %v566_v35 = vcombine.high %v74_v30, %v78_v31  ;;  %v71_v37 = vld [vmem:[#allocation2 + $0x38] sm:$0xff]  ;;  %v565_v38 = vcombine.low %v74_v30, %v78_v31  ;;  %v60_v44 = vpack.c.bf16 %v52_v40, %v52_v40  ;;  %v54_v49 = vld [vmem:[%s875_s0 + $0x30] sm:$0xff]  ;;  %v643_v51 = vld [vmem:[%s879_s4 + $0x8] sm:$0xff]  }
  0x1b   :  { %v560_v39 = vcombine.high %v67_v36, %v71_v37  ;;  %v55_v41 = vld [vmem:[%s875_s0 + $0x38] sm:$0xff]  ;;  %v559_v45 = vcombine.low %v67_v36, %v71_v37  ;;  %v62_v50 = vpack.c.bf16 %v54_v49, %v54_v49  ;;  %v360_v52 = vsel %vm352_vm0, %v643_v51, 0  ;;  %v327_v53 = vld [vmem:[%s878_s3] sm:$0xf]  ;;  %v645_v2 = vld [vmem:[%s882_s7 + $0x8] sm:$0xff]  }
  0x1c   :  { %v75_v42 = vld [vmem:[#allocation2 + $0x58] sm:$0xff]  ;;  %v63_v46 = vpack.c.bf16 %v55_v41, %v55_v41  ;;  %v552_v54 = vld [vmem:[%s877_s2] ss:$0 sm:$0xff]  ;;  %v328_v55 = vunpack.c.l.bf16 %v327_v53  ;;  %v476_v3 = vsel %vm352_vm0, %v645_v2, 0  ;;  %v646_v4 = vld [vmem:[%s882_s7 + $0x10] sm:$0xff]  }
  0x1d   :  { %v79_v43 = vld [vmem:[#allocation2 + $0x78] sm:$0xff]  ;;  %v644_v59 = vld [vmem:[%s882_s7] sm:$0xff]   ;;  %v479_v5 = vsel %vm352_vm0, %v646_v4, 0  ;;  %v649_v10 = vld [vmem:[%s882_s7 + $0x28] sm:$0xff]  }
  0x1e   :  { %v568_v47 = vcombine.high %v75_v42, %v79_v43  ;;  %v567_v48 = vcombine.low %v75_v42, %v79_v43  ;;  %v473_v1 = vsel %vm352_vm0, %v644_v59, 0  ;;  %v647_v6 = vld [vmem:[%s882_s7 + $0x18] sm:$0xff]   ;;  %v648_v8 = vld [vmem:[%s882_s7 + $0x20] sm:$0xff]   ;;  %v488_v11 = vsel %vm352_vm0, %v649_v10, 0 }
  0x1f   :  { %v482_v7 = vsel %vm352_vm0, %v647_v6, 0  ;;  %v485_v9 = vsel %vm352_vm0, %v648_v8, 0  ;;  %v402_v16 = vld [vmem:[%s881_s6] sm:$0xf]  ;;  %s543_s6 = sshll.u32 %s705_s20, 4  ;;  %s544_s6 = int_to_ptr.vmem [resolvable:$true] %s543_s6 }
  0x20   :  { %170 = vmatpush1.bf16.xpose.msra.mxu0 %v561_v12  ;;  %v650_v12 = vld [vmem:[%s882_s7 + $0x30] sm:$0xff]   ;;  %v569_v17 = vld [vmem:[%s880_s5] ss:$0 sm:$0xff]  ;;  %v403_v18 = vunpack.c.l.bf16 %v402_v16  ;;  %s674_s5 = scalar_lea.vmem %s544_s6, 128  ;;  %p679_p9 = scmp.lt.s32.totalorder %s544_s6, %s544_s6 }
  0x21   :  { %207 = vmatprep.subr.bf16.mxu0 %v556_v14  ;;  %598 = vmatpush3.bf16.xpose.msra.mxu1 %v360_v52  ;;  %v491_v13 = vsel %vm352_vm0, %v650_v12, 0  ;;  %v651_v14 = vld [vmem:[%s882_s7 + $0x38] sm:$0xff]   ;;  %v573_v25 = vld [vmem:[%s883_s8] ss:$0 sm:$0xff]  ;;  %p675_p8 = scmp.ne.s32.totalorder %s544_s6, %s674_s5  ;;  %p680_p10 = scmp.lt.s32.totalorder %s674_s5, %s674_s5 }
  0x22   :  { %603 = vmatprep.subr.bf16.mxu1 %v703_v0  ;;  %v494_v15 = vsel %vm352_vm0, %v651_v14, 0 }
  0x23   :  { %p681_p11 = por %p680_p10, %p679_p9 }
  0x25   :  { %p682_p12 = pnand %p681_p11, %p675_p8 }
  0x27   :  { %200 = vmatmul.mubr.bf16.vlgmr.msra.gmra.mrb[0].mxu0 %v56_v20 }
  0x28   :  { %208 = vmatpush1.bf16.xpose.msra.mxu0 %v555_v21  ;;  %239 = vmatprep.mubr.bf16.mxu0 %v59_v22 }
  0x29   :  { %209 = vmatprep.subr.bf16.mxu0 %v564_v23 }
  0x30   :  { %210 = vmatpush1.bf16.xpose.msra.mxu0 %v563_v26 }
  0x31   :  { %247 = vmatprep.subr.bf16.mxu0 %v558_v27 }
  0x37   :  { %240 = vmatmul.mubr.bf16.vlgmr.msra.gmra.mrb[0].mxu0 %v58_v32 }
  0x38   :  { %248 = vmatpush1.bf16.xpose.msra.mxu0 %v557_v33  ;;  %279 = vmatprep.mubr.bf16.mxu0 %v61_v34 }
  0x39   :  { %249 = vmatprep.subr.bf16.mxu0 %v566_v35 }
  0x40   :  { %250 = vmatpush1.bf16.xpose.msra.mxu0 %v565_v38 }
  0x41   :  { %287 = vmatprep.subr.bf16.mxu0 %v560_v39 }
  0x47   :  { %280 = vmatmul.mubr.bf16.vlgmr.msra.gmra.mrb[0].mxu0 %v60_v44 }
  0x48   :  { %288 = vmatpush1.bf16.xpose.msra.mxu0 %v559_v45  ;;  %319 = vmatprep.mubr.bf16.mxu0 %v63_v46 }
  0x49   :  { %289 = vmatprep.subr.bf16.mxu0 %v568_v47 }
  0x50   :  { %290 = vmatpush1.bf16.xpose.msra.mxu0 %v567_v48 }
  0x57   :  { %320 = vmatmul.mubr.bf16.vlgmr.msra.gmra.mrb[0].mxu0 %v62_v50 }
 0x12a   :  { %v321_v56 = vpop.f32.mrb[0].mxu0 }
 0x12b   :  { %v623_v57 = vadd.f32 %v552_v54, %v321_v56  ;;  %v323_v58 = vpop.f32.mrb[1].mxu0 }
 0x12c   :  { %v324_v60 = vpop.f32.mrb[2].mxu0 }
 0x12d   :  { %v329_v61 = vmul.f32 %v623_v57, %v328_v55  ;;  %v325_v62 = vpop.f32.mrb[3].mxu0 }
 0x12f   :  { %v330_v63 = vpack.c.bf16 %v329_v61, %v329_v61 }
 0x131   :  { %600 = vmatmul.mubr.msk.bf16.vlgmr.msra.gmra.mrb[0].mxu1 %vm352_vm0, %v330_v63 }
 0x132   :  { %604 = vmatpush3.bf16.xpose.msra.mxu1 %v473_v1  ;;  %619 = vmatprep.mubr.msk.bf16.mxu1 %vm704_vm1, %v703_v0 }
 0x133   :  { %605 = vmatprep.subr.bf16.mxu1 %v703_v0 }
 0x13a   :  { %606 = vmatpush3.bf16.xpose.msra.mxu1 %v476_v3 }
 0x13b   :  { %607 = vmatprep.subr.bf16.mxu1 %v703_v0 }
 0x142   :  { %608 = vmatpush3.bf16.xpose.msra.mxu1 %v479_v5 }
 0x143   :  { %609 = vmatprep.subr.bf16.mxu1 %v703_v0 }
 0x14a   :  { %610 = vmatpush3.bf16.xpose.msra.mxu1 %v482_v7 }
 0x14b   :  { %611 = vmatprep.subr.bf16.mxu1 %v703_v0 }
 0x152   :  { %612 = vmatpush3.bf16.xpose.msra.mxu1 %v485_v9 }
 0x153   :  { %613 = vmatprep.subr.bf16.mxu1 %v703_v0 }
 0x15a   :  { %614 = vmatpush3.bf16.xpose.msra.mxu1 %v488_v11 }
 0x15b   :  { %615 = vmatprep.subr.bf16.mxu1 %v703_v0 }
 0x162   :  { %616 = vmatpush3.bf16.xpose.msra.mxu1 %v491_v13 }
 0x163   :  { %617 = vmatprep.subr.bf16.mxu1 %v703_v0 }
 0x16a   :  { %618 = vmatpush3.bf16.xpose.msra.mxu1 %v494_v15 }
 0x204   :  { %v396_v19 = vpop.f32.mrb[0].mxu1 }
 0x205   :  { %v397_v20 = vadd.f32 %v569_v17, %v396_v19  ;;  %v601_v21 = vpop.f32.mrb[1].mxu1 }
 0x206   :  { %v399_v0 = vpop.f32.mrb[2].mxu1 }
 0x207   :  { %v404_v22 = vmul.f32 %v403_v18, %v397_v20  ;;  %v602_v23 = vpop.f32.mrb[3].mxu1 }
 0x209   :  { %v405_v24 = vpack.c.bf16 %v404_v22, %v404_v22 }
 0x20b   :  { %620 = vmatmul.mubr.msk.bf16.vlgmr.msra.gmra.mrb[4].mxu1 %vm352_vm0, %v405_v24 }
 0x2de   :  { %v530_v26 = vpop.f32.mrb[4].mxu1 }
 0x2df   :  { %v531_v27 = vadd.f32 %v573_v25, %v530_v26  ;;  %v621_v28 = vpop.f32.mrb[5].mxu1 }
 0x2e0   :  { %v533_v29 = vpop.f32.mrb[6].mxu1 }
 0x2e1   :  { %536 = vst [vmem:[#allocation5] sm:$0xff] %v531_v27  ;;  %v622_v30 = vpop.f32.mrb[7].mxu1 }
 0x2e2   :  { %685 = shalt.err (!%p682_p12)
}
 0x2e3   :  { %s686_s8 = scalar_lea.hbm %s884_s9, 128 }
 0x2e4   :  { %p687_p13 = scmp.ne.s32.totalorder %s884_s9, %s686_s8  ;;  %p690_p0 = scmp.lt.u32.totalorder %s686_s8, %s884_s9 }
 0x2e6   :  { %p692_p1 = pnand %p690_p0, %p687_p13 }
 0x2e8   :  { %695 = shalt.err (!%p692_p1)
}
 0x2e9   :  { %546 = dma.vmem_to_hbm [thread:$0]  %s544_s6, 128, %s884_s9, [#allocation4]  }
 0x2ea   :  { %698 = dma.done.wait [#allocation4], 128  }
 0x2eb   :  { %699 = vsyncadd [#allocation4], 4294967168 }
 0x2ec   :  { %550 = vsyncpa [#allocation3], 1 }
 0x2ed   :  { %551 = vsyncpa [#allocation4], 1 }

</bundles_post_ra>
